<compile_context>
chip_gen: v7x
topology: tpu7x:2x2x1
jax: 0.10.0
libtpu: 0.0.40
codegen_flags: <defaults>
</compile_context>

<pallas_src>
import jax
import jax.numpy as jnp
from jax.experimental import pallas as pl
from jax.experimental.pallas import tpu as pltpu

_SMOOTH = 1e-05
_R = 0.1
_LANES = 128
_TM_MAX = 2048  # max sublane rows / grid step: 2048*128*4B * 2 in * 2 buf = 8 MiB VMEM


def _ss_sums_kernel(x_ref, t_ref, o_ref, acc_ref):
    """Accumulates per-lane partial sums of [se*t, se*(1-t), t] into VMEM scratch."""
    i = pl.program_id(1)  # arbitrary (sequential) inner axis

    @pl.when(i == 0)
    def _():
        acc_ref[...] = jnp.zeros_like(acc_ref)

    x = x_ref[...].astype(jnp.float32)
    t = t_ref[...].astype(jnp.float32)

    p = jax.nn.sigmoid(x)          # EUP (free slot relative to VPU/DMA)
    d = p - t
    se = d * d                     # (p - t)^2
    fg = se * t                    # (p - t)^2 * y_true

    # Fold the (block_rows, 128) tile to an (8, 128) per-lane partial sum:
    # pure cross-vreg VPU adds (no XLU cross-lane reduction in the hot loop).
    block_rows = x_ref.shape[0]
    nsub = block_rows // 8

    def fold(v):
        return jnp.sum(v.reshape(nsub, 8, _LANES), axis=0)

    se_f = fold(se)
    fg_f = fold(fg)
    acc_ref[0] += fg_f
    acc_ref[1] += se_f - fg_f      # fold(se * (1 - t)) done on the small partials
    acc_ref[2] += fold(t)

    @pl.when(i == pl.num_programs(1) - 1)
    def _():
        o_ref[0] = acc_ref[...]


@jax.jit
def binary_ss_loss(y_pred_logits, y_true):
    """JAX/Pallas equivalent of BinarySSLoss.forward (NCHW inputs)."""
    if not jnp.issubdtype(y_pred_logits.dtype, jnp.floating):
        y_pred_logits = y_pred_logits.astype(jnp.float32)
    if not jnp.issubdtype(y_true.dtype, jnp.floating):
        y_true = y_true.astype(jnp.float32)

    n_elems = y_pred_logits.size  # static under jit
    # TODO(synk): int sizing assumes n_elems < 2**31 elements.

    # ---- static tiling decisions (all from static shapes) -------------------
    n_rows = pl.cdiv(n_elems, _LANES)
    n_blocks = pl.cdiv(n_rows, _TM_MAX)
    n_outer = 2 if n_blocks >= 2 else 1          # v7x: one outer step per TC
    n_inner = pl.cdiv(n_blocks, n_outer)
    n_blk_total = n_outer * n_inner
    # Rows per block, multiple of 8, chosen so the blocks cover n_rows with
    # minimal tail padding (<= 7 rows beyond the lane remainder).
    tm = pl.cdiv(pl.cdiv(n_rows, n_blk_total), 8) * 8
    n_rows_pad = n_blk_total * tm
    n_total = n_rows_pad * _LANES
    needs_pad = n_total != n_elems

    # ---- flatten to a lane-dense slab; pad only when required ---------------
    # Padded logits -> finfo.min so sigmoid(pad) == 0, padded targets -> 0:
    # every padded element contributes exactly 0 to all three accumulated sums,
    # so no in-kernel masking is needed.
    def to_slab(a, pad_value):
        flat = a.reshape(-1)                      # native dtype, no upcast
        if needs_pad:
            flat = jnp.pad(flat, (0, n_total - n_elems), constant_values=pad_value)
        return flat.reshape(n_rows_pad, _LANES)

    x2 = to_slab(y_pred_logits, float(jnp.finfo(y_pred_logits.dtype).min))
    t2 = to_slab(y_true, 0.0)

    in_map = lambda c, i: (c * n_inner + i, 0)
    bytes_accessed = (n_total * (x2.dtype.itemsize + t2.dtype.itemsize)
                      + n_outer * 3 * 8 * _LANES * 4)

    partials = pl.pallas_call(
        _ss_sums_kernel,
        out_shape=jax.ShapeDtypeStruct((n_outer, 3, 8, _LANES), jnp.float32),
        grid_spec=pltpu.PrefetchScalarGridSpec(
            num_scalar_prefetch=0,
            grid=(n_outer, n_inner),
            in_specs=[
                pl.BlockSpec((tm, _LANES), in_map),
                pl.BlockSpec((tm, _LANES), in_map),
            ],
            out_specs=pl.BlockSpec((1, 3, 8, _LANES), lambda c, i: (c, 0, 0, 0)),
            scratch_shapes=[pltpu.VMEM((3, 8, _LANES), jnp.float32)],
        ),
        compiler_params=pltpu.CompilerParams(
            dimension_semantics=("parallel", "arbitrary")),
        cost_estimate=pl.CostEstimate(
            flops=8 * n_elems,
            transcendentals=n_elems,
            bytes_accessed=int(bytes_accessed)),
    )(x2, t2)

    # ---- tiny scalar glue (mirrors the PyTorch module exactly) --------------
    sums = jnp.sum(partials, axis=(0, 2, 3))      # (3,)
    fg_sum, bg_sum, t_sum = sums[0], sums[1], sums[2]
    bg_true_sum = jnp.float32(n_elems) - t_sum    # sum(1 - t)

    specificity_part = fg_sum / (_SMOOTH + t_sum)
    sensitivity_part = bg_sum / (_SMOOTH + bg_true_sum)
    ss = _R * specificity_part + (1.0 - _R) * sensitivity_part
    return ss  # .mean() of a scalar is the identity


def _reference(y_pred_logits, y_true):
    """Pure-JAX reference for sanity checking."""
    p = jax.nn.sigmoid(y_pred_logits.astype(jnp.float32))
    t = y_true.astype(jnp.float32)
    se = (p - t) ** 2
    spec = jnp.sum(se * t) / (_SMOOTH + jnp.sum(t))
    sens = jnp.sum(se * (1.0 - t)) / (_SMOOTH + jnp.sum(1.0 - t))
    return _R * spec + (1.0 - _R) * sens


if __name__ == "__main__":
    key = jax.random.PRNGKey(0)
    k1, k2, k3, k4 = jax.random.split(key, 4)

    # NCHW, binary segmentation style inputs (lane-aligned case).
    B, C, H, W = 2, 4, 16, 16
    y_pred_logits = jax.random.normal(k1, (B, C, H, W), dtype=jnp.float32) * 2.0
    y_true = (jax.random.uniform(k2, (B, C, H, W)) > 0.5).astype(jnp.float32)

    loss = jax.block_until_ready(binary_ss_loss(y_pred_logits, y_true))
    ref = _reference(y_pred_logits, y_true)
    assert jnp.allclose(loss, ref, rtol=1e-5, atol=1e-5), (loss, ref)

    # Unaligned case (exercises the padding path).
    y_pred2 = jax.random.normal(k3, (2, 3, 15, 17), dtype=jnp.float32) * 2.0
    y_true2 = (jax.random.uniform(k4, (2, 3, 15, 17)) > 0.5).astype(jnp.float32)

    loss2 = jax.block_until_ready(binary_ss_loss(y_pred2, y_true2))
    ref2 = _reference(y_pred2, y_true2)
    assert jnp.allclose(loss2, ref2, rtol=1e-5, atol=1e-5), (loss2, ref2)

    print("KERNEL_OK")
</pallas_src>

<mosaic_0001>
module attributes {stable_mosaic.version = 11 : i64} {
  func.func @_ss_sums_kernel(%arg0: i32, %arg1: i32, %arg2: memref<16x128xf32, #tpu.memory_space<vmem>>, %arg3: memref<16x128xf32, #tpu.memory_space<vmem>>, %arg4: memref<1x3x8x128xf32, #tpu.memory_space<vmem>>, %arg5: memref<3x8x128xf32, #tpu.memory_space<vmem>>) attributes {dimension_semantics = [#tpu.dimension_semantics<parallel>, #tpu.dimension_semantics<arbitrary>], iteration_bounds = array<i64: 1, 1>, scalar_prefetch = 0 : i64, scratch_operands = 1 : i64, tpu.core_type = #tpu.core_type<tc>, window_params = [{transform_indices = @transform_0, window_bounds = array<i64: 16, 128>}, {transform_indices = @transform_1, window_bounds = array<i64: 16, 128>}, {transform_indices = @transform_2, window_bounds = array<i64: 1, 3, 8, 128>}]} {
    %c0_i32 = arith.constant 0 : i32
    %0 = arith.cmpi eq, %arg1, %c0_i32 : i32
    %1 = arith.extui %0 : i1 to i32
    %c0_i32_0 = arith.constant 0 : i32
    %2 = arith.cmpi ne, %1, %c0_i32_0 : i32
    scf.if %2 {
      %cst_25 = arith.constant 0.000000e+00 : f32
      %41 = vector.broadcast %cst_25 : f32 to vector<3x8x128xf32>
      %c0_26 = arith.constant 0 : index
      %c0_27 = arith.constant 0 : index
      %c0_28 = arith.constant 0 : index
      %42 = vector.load %arg5[%c0_26, %c0_27, %c0_28] : memref<3x8x128xf32, #tpu.memory_space<vmem>>, vector<3x8x128xf32>
      tpu.vector_store %arg5[%c0_26, %c0_27, %c0_28], %41 {strides = array<i32>} : memref<3x8x128xf32, #tpu.memory_space<vmem>>, vector<3x8x128xf32>,
    } else {
    }
    %c0 = arith.constant 0 : index
    %c0_1 = arith.constant 0 : index
    %3 = vector.load %arg2[%c0, %c0_1] : memref<16x128xf32, #tpu.memory_space<vmem>>, vector<16x128xf32>
    %c0_2 = arith.constant 0 : index
    %c0_3 = arith.constant 0 : index
    %4 = vector.load %arg3[%c0_2, %c0_3] : memref<16x128xf32, #tpu.memory_space<vmem>>, vector<16x128xf32>
    %5 = arith.negf %3 : vector<16x128xf32>
    %6 = math.exp %5 : vector<16x128xf32>
    %cst = arith.constant 1.000000e+00 : f32
    %7 = vector.broadcast %cst : f32 to vector<16x128xf32>
    %8 = arith.addf %7, %6 : vector<16x128xf32>
    %9 = arith.divf %7, %8 : vector<16x128xf32>
    %10 = arith.subf %9, %4 : vector<16x128xf32>
    %11 = arith.mulf %10, %10 : vector<16x128xf32>
    %12 = arith.mulf %11, %4 : vector<16x128xf32>
    %13 = vector.shape_cast %11 : vector<16x128xf32> to vector<2x8x128xf32>
    %cst_4 = arith.constant dense<0.000000e+00> : vector<8x128xf32>
    %14 = vector.multi_reduction <add>, %13, %cst_4 [0] : vector<2x8x128xf32> to vector<8x128xf32>
    %15 = vector.shape_cast %12 : vector<16x128xf32> to vector<2x8x128xf32>
    %cst_5 = arith.constant dense<0.000000e+00> : vector<8x128xf32>
    %16 = vector.multi_reduction <add>, %15, %cst_5 [0] : vector<2x8x128xf32> to vector<8x128xf32>
    %c0_6 = arith.constant 0 : index
    %c0_7 = arith.constant 0 : index
    %c0_8 = arith.constant 0 : index
    %17 = vector.load %arg5[%c0_6, %c0_7, %c0_8] : memref<3x8x128xf32, #tpu.memory_space<vmem>>, vector<1x8x128xf32>
    %18 = vector.shape_cast %17 : vector<1x8x128xf32> to vector<8x128xf32>
    %19 = arith.addf %18, %16 : vector<8x128xf32>
    %c0_9 = arith.constant 0 : index
    %c0_10 = arith.constant 0 : index
    %c0_11 = arith.constant 0 : index
    %20 = vector.load %arg5[%c0_9, %c0_10, %c0_11] : memref<3x8x128xf32, #tpu.memory_space<vmem>>, vector<1x8x128xf32>
    %21 = vector.shape_cast %20 : vector<1x8x128xf32> to vector<8x128xf32>
    %22 = vector.shape_cast %19 : vector<8x128xf32> to vector<1x8x128xf32>
    tpu.vector_store %arg5[%c0_9, %c0_10, %c0_11], %22 {strides = array<i32>} : memref<3x8x128xf32, #tpu.memory_space<vmem>>, vector<1x8x128xf32>,
    %c1 = arith.constant 1 : index
    %c0_12 = arith.constant 0 : index
    %c0_13 = arith.constant 0 : index
    %23 = vector.load %arg5[%c1, %c0_12, %c0_13] : memref<3x8x128xf32, #tpu.memory_space<vmem>>, vector<1x8x128xf32>
    %24 = vector.shape_cast %23 : vector<1x8x128xf32> to vector<8x128xf32>
    %25 = arith.subf %14, %16 : vector<8x128xf32>
    %26 = arith.addf %24, %25 : vector<8x128xf32>
    %c1_14 = arith.constant 1 : index
    %c0_15 = arith.constant 0 : index
    %c0_16 = arith.constant 0 : index
    %27 = vector.load %arg5[%c1_14, %c0_15, %c0_16] : memref<3x8x128xf32, #tpu.memory_space<vmem>>, vector<1x8x128xf32>
    %28 = vector.shape_cast %27 : vector<1x8x128xf32> to vector<8x128xf32>
    %29 = vector.shape_cast %26 : vector<8x128xf32> to vector<1x8x128xf32>
    tpu.vector_store %arg5[%c1_14, %c0_15, %c0_16], %29 {strides = array<i32>} : memref<3x8x128xf32, #tpu.memory_space<vmem>>, vector<1x8x128xf32>,
    %c2 = arith.constant 2 : index
    %c0_17 = arith.constant 0 : index
    %c0_18 = arith.constant 0 : index
    %30 = vector.load %arg5[%c2, %c0_17, %c0_18] : memref<3x8x128xf32, #tpu.memory_space<vmem>>, vector<1x8x128xf32>
    %31 = vector.shape_cast %30 : vector<1x8x128xf32> to vector<8x128xf32>
    %32 = vector.shape_cast %4 : vector<16x128xf32> to vector<2x8x128xf32>
    %cst_19 = arith.constant dense<0.000000e+00> : vector<8x128xf32>
    %33 = vector.multi_reduction <add>, %32, %cst_19 [0] : vector<2x8x128xf32> to vector<8x128xf32>
    %34 = arith.addf %31, %33 : vector<8x128xf32>
    %c2_20 = arith.constant 2 : index
    %c0_21 = arith.constant 0 : index
    %c0_22 = arith.constant 0 : index
    %35 = vector.load %arg5[%c2_20, %c0_21, %c0_22] : memref<3x8x128xf32, #tpu.memory_space<vmem>>, vector<1x8x128xf32>
    %36 = vector.shape_cast %35 : vector<1x8x128xf32> to vector<8x128xf32>
    %37 = vector.shape_cast %34 : vector<8x128xf32> to vector<1x8x128xf32>
    tpu.vector_store %arg5[%c2_20, %c0_21, %c0_22], %37 {strides = array<i32>} : memref<3x8x128xf32, #tpu.memory_space<vmem>>, vector<1x8x128xf32>,
    %c0_i32_23 = arith.constant 0 : i32
    %38 = arith.cmpi eq, %arg1, %c0_i32_23 : i32
    %39 = arith.extui %38 : i1 to i32
    %c0_i32_24 = arith.constant 0 : i32
    %40 = arith.cmpi ne, %39, %c0_i32_24 : i32
    scf.if %40 {
      %c0_25 = arith.constant 0 : index
      %c0_26 = arith.constant 0 : index
      %c0_27 = arith.constant 0 : index
      %41 = vector.load %arg5[%c0_25, %c0_26, %c0_27] : memref<3x8x128xf32, #tpu.memory_space<vmem>>, vector<3x8x128xf32>
      %c0_28 = arith.constant 0 : index
      %c0_29 = arith.constant 0 : index
      %c0_30 = arith.constant 0 : index
      %c0_31 = arith.constant 0 : index
      %42 = vector.load %arg4[%c0_28, %c0_29, %c0_30, %c0_31] : memref<1x3x8x128xf32, #tpu.memory_space<vmem>>, vector<1x3x8x128xf32>
      %43 = vector.shape_cast %42 : vector<1x3x8x128xf32> to vector<3x8x128xf32>
      %44 = vector.shape_cast %41 : vector<3x8x128xf32> to vector<1x3x8x128xf32>
      tpu.vector_store %arg4[%c0_28, %c0_29, %c0_30, %c0_31], %44 {strides = array<i32>} : memref<1x3x8x128xf32, #tpu.memory_space<vmem>>, vector<1x3x8x128xf32>,
    } else {
    }
    return
  }
  func.func @transform_0(%arg0: i32, %arg1: i32) -> (i32, i32) {
    %c1_i32 = arith.constant 1 : i32
    %0 = arith.muli %arg0, %c1_i32 : i32
    %1 = arith.addi %0, %arg1 : i32
    %c0_i32 = arith.constant 0 : i32
    %c0_i32_0 = arith.constant 0 : i32
    return %1, %c0_i32 : i32, i32
  }
  func.func @transform_1(%arg0: i32, %arg1: i32) -> (i32, i32) {
    %c1_i32 = arith.constant 1 : i32
    %0 = arith.muli %arg0, %c1_i32 : i32
    %1 = arith.addi %0, %arg1 : i32
    %c0_i32 = arith.constant 0 : i32
    %c0_i32_0 = arith.constant 0 : i32
    return %1, %c0_i32 : i32, i32
  }
  func.func @transform_2(%arg0: i32, %arg1: i32) -> (i32, i32, i32, i32) {
    %c0_i32 = arith.constant 0 : i32
    %c0_i32_0 = arith.constant 0 : i32
    %c0_i32_1 = arith.constant 0 : i32
    %c0_i32_2 = arith.constant 0 : i32
    return %arg0, %c0_i32, %c0_i32_0, %c0_i32_1 : i32, i32, i32, i32
  }
}

</mosaic_0001>

<bundles_post_ra>
// kernel: binary_ss_loss.1
= control target key start
LH: loop header
LB: loop body
LE: loop exit
PB: predicated region body
PF: predicated region fallthrough
CT: control target
= control target key end

     0   :  { %s170_s0 = inlined_call_operand.vmem [shape: f32[16,128], index: 0, kind: input, shape index: {}]   ;;  %s171_s1 = inlined_call_operand.vmem [shape: f32[16,128], index: 1, kind: input, shape index: {}]   ;;  %s172_s2 = inlined_call_operand.vmem [shape: f32[1,3,8,128], index: 2, kind: output, shape index: {}]  }
   0x1   :  { %v62_v0 = vld [vmem:[%s170_s0] sm:$0xff]  ;;  %v63_v1 = vld [vmem:[%s170_s0 + $0x8] sm:$0xff] }
   0x2   :  { %v64_v2 = vld [vmem:[%s171_s1] sm:$0xff]  ;;  %v65_v3 = vld [vmem:[%s171_s1 + $0x8] sm:$0xff]  ;;  %v124_v4 = vmul.f32 -1.442695, %v62_v0  ;;  %v125_v5 = vmul.f32 -1.442695, %v63_v1 }
   0x3   :  { %v96_v6 = vadd.f32 %v65_v3, %v64_v2 }
   0x4   :  { %126 = vpow2.f32 %v124_v4 }
   0x5   :  { %128 = vpow2.f32 %v125_v5  ;;  %107 = vst [vmem:[%s172_s2 + $0x10] sm:$0xff] %v96_v6 }
   0xe   :  { %v127_v7 = vpop.eup %126 }
   0xf   :  { %v129_v8 = vpop.eup %128  ;;  %v72_v9 = vadd.f32 1.0, %v127_v7 }
  0x10   :  { %v73_v10 = vadd.f32 1.0, %v129_v8 }
  0x11   :  { %130 = vrcp.f32 %v72_v9 }
  0x12   :  { %132 = vrcp.f32 %v73_v10 }
  0x1b   :  { %v131_v11 = vpop.eup %130 }
  0x1c   :  { %v133_v12 = vpop.eup %132  ;;  %v78_v13 = vsub.f32 %v131_v11, %v64_v2 }
  0x1d   :  { %v79_v14 = vsub.f32 %v133_v12, %v65_v3 }
  0x1e   :  { %v80_v15 = vmul.f32 %v78_v13, %v78_v13 }
  0x1f   :  { %v81_v16 = vmul.f32 %v79_v14, %v79_v14 }
  0x20   :  { %v82_v17 = vmul.f32 %v80_v15, %v64_v2 }
  0x21   :  { %v83_v18 = vmul.f32 %v81_v16, %v65_v3  ;;  %v84_v19 = vadd.f32 %v81_v16, %v80_v15 }
  0x23   :  { %v85_v20 = vadd.f32 %v83_v18, %v82_v17 }
  0x25   :  { %105 = vst [vmem:[%s172_s2] sm:$0xff] %v85_v20  ;;  %v91_v21 = vsub.f32 %v84_v19, %v85_v20 }
  0x27   :  { %106 = vst [vmem:[%s172_s2 + $0x8] sm:$0xff] %v91_v21 }

</bundles_post_ra>
